<compile_context>
chip_gen: v6e
topology: v6e:2x2x1
jax: 0.10.0
libtpu: 0.0.40
codegen_flags: <defaults>
</compile_context>

<pallas_src>
from functools import partial
import math

import jax
import jax.numpy as jnp
import numpy as np
from jax.experimental import pallas as pl
from jax.experimental.pallas import tpu as pltpu

DEFAULT_COMPUTE_DTYPE = jnp.bfloat16
LN_EPS = 1e-5
# pl.reciprocal(approx=True) runs on the EUP slot (~free), but attention rows then sum
# to 1 only up to ~1e-3 relative error.  Flip to False for exact softmax parity.
APPROX_SOFTMAX_RECIPROCAL = True


# ---------------------------------------------------------------------------
# Host-side weight folding (done ONCE, outside the jitted forward).
# linear_{q,k,v} followed by MHA's in_proj are chained affine maps -> fold them into a
# single (E,E) / (E,2E) map; fold the 1/sqrt(head_dim) scale into the q weights; stack
# k/v; store weights TRANSPOSED as (K, Eo) so the kernel uses jnp.dot(x, w) directly.
# ---------------------------------------------------------------------------
def fold_params(p, num_heads, compute_dtype=DEFAULT_COMPUTE_DTYPE):
    e = p["wq_lin"].shape[0]
    assert e % num_heads == 0, "input_size must be divisible by num_heads"
    scale = 1.0 / math.sqrt(e // num_heads)
    wq = (p["wq_in"] @ p["wq_lin"]) * scale                  # (E, E)
    bq = (p["wq_in"] @ p["bq_lin"] + p["bq_in"]) * scale     # (E,)
    wk = p["wk_in"] @ p["wk_lin"]
    bk = p["wk_in"] @ p["bk_lin"] + p["bk_in"]
    wv = p["wv_in"] @ p["wv_lin"]
    bv = p["wv_in"] @ p["bv_lin"] + p["bv_in"]
    # NOTE: casting the folded *product* weights to bf16 loses marginally more precision
    # than two separate bf16 matmuls with fp32 accumulation; fine at the test tolerance.
    # TODO(synk): optional fp8 weight quantization for the three GEMMs on v7x (fp32 acc).
    return {
        "wq_t": wq.T.astype(compute_dtype),                                    # (E, E)
        "bq": bq.reshape(1, e).astype(jnp.float32),
        "wkv_t": jnp.concatenate([wk.T, wv.T], axis=1).astype(compute_dtype),  # (E, 2E)
        "bkv": jnp.concatenate([bk, bv]).reshape(1, 2 * e).astype(jnp.float32),
        "wo_t": p["wo"].T.astype(compute_dtype),                               # (E, E)
        "bo": p["bo"].reshape(1, e).astype(jnp.float32),
        "gamma": p["gamma"].reshape(1, e).astype(jnp.float32),
        "beta": p["beta"].reshape(1, e).astype(jnp.float32),
    }


# ---------------------------------------------------------------------------
# Fused kernel: one grid step = one batch element.
#   q proj -> kv proj -> head-batched attention -> out_proj -> residual -> LayerNorm
# ---------------------------------------------------------------------------
def _fused_cross_attn_kernel(x1_ref, x2_ref, wq_ref, bq_ref, wkv_ref, bkv_ref,
                             wo_ref, bo_ref, g_ref, b_ref, o_ref, *,
                             num_heads, head_dim, compute_dtype, eps, approx_recip):
    e = num_heads * head_dim
    x1 = x1_ref[0]                          # (L, E) fp32 (kept fp32 for the residual)
    x2 = x2_ref[0]                          # (S, E) compute dtype

    # --- fused q / kv projections (1/sqrt(d) already folded into the q weights) -----
    q = jnp.dot(x1.astype(compute_dtype), wq_ref[...],
                preferred_element_type=jnp.float32) + bq_ref[...]        # (L, E) fp32
    kv = jnp.dot(x2, wkv_ref[...],
                 preferred_element_type=jnp.float32) + bkv_ref[...]      # (S, 2E) fp32
    q = q.astype(compute_dtype)
    kv = kv.astype(compute_dtype)
    k = kv[:, :e]                           # (S, E)  (tile-aligned view when E % 128 == 0)
    v = kv[:, e:]                           # (S, E)

    # --- head-batched attention: heads on a leading (non-lane) axis, one batched
    #     dot_general per matmul instead of H separate sub-128-lane matmuls. ---------
    def to_heads(t):                        # (R, E) -> (H, R, d), done once per operand
        return jnp.stack(
            [t[:, h * head_dim:(h + 1) * head_dim] for h in range(num_heads)], axis=0)

    qh, kh, vh = to_heads(q), to_heads(k), to_heads(v)
    s = jnp.einsum("hld,hsd->hls", qh, kh,
                   preferred_element_type=jnp.float32)                   # (H, L, S) fp32
    mx = jnp.max(s, axis=-1, keepdims=True)
    p = jnp.exp(s - mx)
    denom = jnp.sum(p, axis=-1, keepdims=True)
    if approx_recip:
        p = p * pl.reciprocal(denom, approx=True)
    else:
        p = p / denom
    ctx = jnp.einsum("hls,hsd->hld", p.astype(compute_dtype), vh,
                     preferred_element_type=jnp.float32)                 # (H, L, d) fp32

    # Reassemble a lane-dense (L, E) tensor once (single store path downstream).
    attn = jnp.concatenate([ctx[h] for h in range(num_heads)], axis=-1)  # (L, E) fp32

    # --- out_proj + residual + LayerNorm (fp32 statistics), single (L, E) store -----
    t = jnp.dot(attn.astype(compute_dtype), wo_ref[...],
                preferred_element_type=jnp.float32) + bo_ref[...]        # (L, E) fp32
    y = t + x1
    mean = jnp.mean(y, axis=-1, keepdims=True)
    c = y - mean
    var = jnp.mean(c * c, axis=-1, keepdims=True)
    inv = jax.lax.rsqrt(var + eps)
    o_ref[0, :, :] = (c * inv * g_ref[...] + b_ref[...]).astype(o_ref.dtype)


def fused_cross_attention(x1b, x2b, fp, num_heads, *,
                          compute_dtype=DEFAULT_COMPUTE_DTYPE, eps=LN_EPS):
    n, l, e = x1b.shape
    s_len = x2b.shape[1]
    d = e // num_heads
    csize = jnp.dtype(compute_dtype).itemsize

    weight_bytes = (e * e + e * 2 * e + e * e) * csize + (e + 2 * e + 3 * e) * 4
    block_bytes = l * e * 4 + s_len * e * csize + l * e * 4           # x1 + x2 + out blocks
    scratch_bytes = 4 * (2 * l * e + 3 * s_len * e
                         + 2 * num_heads * l * s_len + 2 * l * e)     # fp32 intermediates
    vmem_limit = int(min(max(2 * block_bytes + weight_bytes + scratch_bytes + (8 << 20),
                             32 << 20), 100 << 20))

    cost = pl.CostEstimate(
        flops=int(2 * n * l * e * e                    # q proj
                  + 2 * n * s_len * e * 2 * e          # kv proj
                  + 4 * n * num_heads * l * s_len * d  # QK^T + PV
                  + 2 * n * l * e * e                  # out proj
                  + 10 * n * l * e),                   # residual + LayerNorm
        transcendentals=int(n * num_heads * l * s_len + n * l),
        bytes_accessed=int(n * l * e * 4 + n * s_len * e * csize
                           + weight_bytes + n * l * e * 4),
    )

    # TODO(synk): for long S / large E on v7x (64 MiB VMEM), add flash-style KV tiling
    # (grid over S chunks + online-softmax m/l/acc scratch) and tile the (E, 2E) kv
    # weight over output columns instead of keeping whole-S blocks / whole weights resident.
    return pl.pallas_call(
        partial(_fused_cross_attn_kernel, num_heads=num_heads, head_dim=d,
                compute_dtype=compute_dtype, eps=eps,
                approx_recip=APPROX_SOFTMAX_RECIPROCAL),
        out_shape=jax.ShapeDtypeStruct((n, l, e), jnp.float32),
        grid=(n,),
        in_specs=[
            pl.BlockSpec((1, l, e), lambda b: (b, 0, 0)),        # x1 (q input + residual)
            pl.BlockSpec((1, s_len, e), lambda b: (b, 0, 0)),    # x2 (kv input)
            pl.BlockSpec((e, e), lambda b: (0, 0)),              # wq_t  (resident)
            pl.BlockSpec((1, e), lambda b: (0, 0)),              # bq
            pl.BlockSpec((e, 2 * e), lambda b: (0, 0)),          # wkv_t (resident)
            pl.BlockSpec((1, 2 * e), lambda b: (0, 0)),          # bkv
            pl.BlockSpec((e, e), lambda b: (0, 0)),              # wo_t  (resident)
            pl.BlockSpec((1, e), lambda b: (0, 0)),              # bo
            pl.BlockSpec((1, e), lambda b: (0, 0)),              # gamma
            pl.BlockSpec((1, e), lambda b: (0, 0)),              # beta
        ],
        out_specs=pl.BlockSpec((1, l, e), lambda b: (b, 0, 0)),
        compiler_params=pltpu.CompilerParams(
            dimension_semantics=("parallel",), vmem_limit_bytes=vmem_limit),
        cost_estimate=cost,
    )(x1b, x2b, fp["wq_t"], fp["bq"], fp["wkv_t"], fp["bkv"],
      fp["wo_t"], fp["bo"], fp["gamma"], fp["beta"])


# ---------------------------------------------------------------------------
# Full forward (interface adapters in plain JAX, all compute in one Pallas kernel)
# ---------------------------------------------------------------------------
def cross_attention_forward(x1, x2, folded, num_heads,
                            compute_dtype=DEFAULT_COMPUTE_DTYPE):
    # torch MHA default is seq-major (L, N, E); the kernel grid is over batch.  x2 is
    # transposed in bf16 (half the HBM traffic of fp32); x1 stays fp32 for the residual.
    # TODO(synk): remove these three XLA transposes by reading per-batch (L, E) slices
    # directly from the seq-major arrays via strided manual DMA (memory_space=pl.ANY).
    x1b = jnp.transpose(x1, (1, 0, 2))                           # (N, L, E) fp32
    x2b = jnp.transpose(x2.astype(compute_dtype), (1, 0, 2))     # (N, S, E) bf16
    y = fused_cross_attention(x1b, x2b, folded, num_heads, compute_dtype=compute_dtype)
    return jnp.transpose(y, (1, 0, 2))                           # (L, N, E) fp32


# ---------------------------------------------------------------------------
# Pure-JAX fp32 reference (mirrors the unfused PyTorch math) for verification
# ---------------------------------------------------------------------------
def reference_forward(x1, x2, p, num_heads):
    l, n, e = x1.shape
    s = x2.shape[0]
    d = e // num_heads
    q = x1 @ p["wq_lin"].T + p["bq_lin"]
    k = x2 @ p["wk_lin"].T + p["bk_lin"]
    v = x2 @ p["wv_lin"].T + p["bv_lin"]
    q = q @ p["wq_in"].T + p["bq_in"]
    k = k @ p["wk_in"].T + p["bk_in"]
    v = v @ p["wv_in"].T + p["bv_in"]
    qh = q.reshape(l, n * num_heads, d).transpose(1, 0, 2)
    kh = k.reshape(s, n * num_heads, d).transpose(1, 0, 2)
    vh = v.reshape(s, n * num_heads, d).transpose(1, 0, 2)
    sc = jnp.einsum("bld,bsd->bls", qh, kh) / jnp.sqrt(jnp.float32(d))
    a = jax.nn.softmax(sc, axis=-1)
    oh = jnp.einsum("bls,bsd->bld", a, vh)
    attn = oh.transpose(1, 0, 2).reshape(l, n, e)
    t = attn @ p["wo"].T + p["bo"]
    y = t + x1
    mean = jnp.mean(y, axis=-1, keepdims=True)
    var = jnp.mean((y - mean) ** 2, axis=-1, keepdims=True)
    return (y - mean) / jnp.sqrt(var + LN_EPS) * p["gamma"] + p["beta"]


def init_params(key, e):
    names_w = ["wq_lin", "wk_lin", "wv_lin", "wq_in", "wk_in", "wv_in", "wo"]
    names_b = ["bq_lin", "bk_lin", "bv_lin", "bq_in", "bk_in", "bv_in", "bo"]
    keys = jax.random.split(key, len(names_w) + len(names_b))
    p = {}
    for i, name in enumerate(names_w):
        p[name] = jax.random.normal(keys[i], (e, e), jnp.float32) * 0.05
    for i, name in enumerate(names_b):
        p[name] = jax.random.normal(keys[len(names_w) + i], (e,), jnp.float32) * 0.01
    p["gamma"] = jnp.ones((e,), jnp.float32)
    p["beta"] = jnp.zeros((e,), jnp.float32)
    return p


if __name__ == "__main__":
    L, S, N, E, H = 8, 8, 2, 32, 8   # query len, key len, batch, input_size, num_heads
    key = jax.random.PRNGKey(0)
    k1, k2, k3 = jax.random.split(key, 3)
    x1 = jax.random.normal(k1, (L, N, E), jnp.float32)
    x2 = jax.random.normal(k2, (S, N, E), jnp.float32)
    params = init_params(k3, E)

    folded = fold_params(params, H)          # folded ONCE, outside the jitted forward
    fwd = jax.jit(partial(cross_attention_forward, num_heads=H))
    out = jax.block_until_ready(fwd(x1, x2, folded))

    ref = reference_forward(x1, x2, params, H)
    assert out.shape == (L, N, E)
    # bf16 matmul operands with fp32 accumulation -> relaxed tolerance vs fp32 reference.
    np.testing.assert_allclose(np.asarray(out), np.asarray(ref), atol=3e-2, rtol=3e-2)
    print("KERNEL_OK")
</pallas_src>

<mosaic_0001>
module attributes {stable_mosaic.version = 11 : i64} {
  func.func @_fused_cross_attn_kernel(%arg0: i32, %arg1: memref<1x8x32xf32, #tpu.memory_space<vmem>>, %arg2: memref<1x8x32xbf16, #tpu.memory_space<vmem>>, %arg3: memref<32x32xbf16, #tpu.memory_space<vmem>>, %arg4: memref<1x32xf32, #tpu.memory_space<vmem>>, %arg5: memref<32x64xbf16, #tpu.memory_space<vmem>>, %arg6: memref<1x64xf32, #tpu.memory_space<vmem>>, %arg7: memref<32x32xbf16, #tpu.memory_space<vmem>>, %arg8: memref<1x32xf32, #tpu.memory_space<vmem>>, %arg9: memref<1x32xf32, #tpu.memory_space<vmem>>, %arg10: memref<1x32xf32, #tpu.memory_space<vmem>>, %arg11: memref<1x8x32xf32, #tpu.memory_space<vmem>>) attributes {dimension_semantics = [#tpu.dimension_semantics<parallel>], iteration_bounds = array<i64: 2>, scalar_prefetch = 0 : i64, scratch_operands = 0 : i64, tpu.core_type = #tpu.core_type<tc>, window_params = [{transform_indices = @transform_0, window_bounds = array<i64: 1, 8, 32>}, {transform_indices = @transform_1, window_bounds = array<i64: 1, 8, 32>}, {pipeline_mode = #tpu.pipeline_mode<synchronous>, transform_indices = @transform_2, window_bounds = array<i64: 32, 32>}, {pipeline_mode = #tpu.pipeline_mode<synchronous>, transform_indices = @transform_3, window_bounds = array<i64: 1, 32>}, {pipeline_mode = #tpu.pipeline_mode<synchronous>, transform_indices = @transform_4, window_bounds = array<i64: 32, 64>}, {pipeline_mode = #tpu.pipeline_mode<synchronous>, transform_indices = @transform_5, window_bounds = array<i64: 1, 64>}, {pipeline_mode = #tpu.pipeline_mode<synchronous>, transform_indices = @transform_6, window_bounds = array<i64: 32, 32>}, {pipeline_mode = #tpu.pipeline_mode<synchronous>, transform_indices = @transform_7, window_bounds = array<i64: 1, 32>}, {pipeline_mode = #tpu.pipeline_mode<synchronous>, transform_indices = @transform_8, window_bounds = array<i64: 1, 32>}, {pipeline_mode = #tpu.pipeline_mode<synchronous>, transform_indices = @transform_9, window_bounds = array<i64: 1, 32>}, {transform_indices = @transform_10, window_bounds = array<i64: 1, 8, 32>}]} {
    %c0 = arith.constant 0 : index
    %c0_0 = arith.constant 0 : index
    %c0_1 = arith.constant 0 : index
    %0 = vector.load %arg1[%c0, %c0_0, %c0_1] : memref<1x8x32xf32, #tpu.memory_space<vmem>>, vector<1x8x32xf32>
    %1 = vector.shape_cast %0 : vector<1x8x32xf32> to vector<8x32xf32>
    %c0_2 = arith.constant 0 : index
    %c0_3 = arith.constant 0 : index
    %c0_4 = arith.constant 0 : index
    %2 = vector.load %arg2[%c0_2, %c0_3, %c0_4] : memref<1x8x32xbf16, #tpu.memory_space<vmem>>, vector<1x8x32xbf16>
    %3 = vector.shape_cast %2 : vector<1x8x32xbf16> to vector<8x32xbf16>
    %4 = arith.truncf %1 : vector<8x32xf32> to vector<8x32xbf16>
    %c0_5 = arith.constant 0 : index
    %c0_6 = arith.constant 0 : index
    %5 = vector.load %arg3[%c0_5, %c0_6] : memref<32x32xbf16, #tpu.memory_space<vmem>>, vector<32x32xbf16>
    %cst = arith.constant dense<0.000000e+00> : vector<8x32xf32>
    %6 = tpu.matmul %4, %5, %cst {dimension_numbers = #tpu.dot_dimension_numbers<[1], [0], [0], [1], [0, 0, 1, 1], [], []>} : vector<8x32xbf16>, vector<32x32xbf16>, vector<8x32xf32> -> vector<8x32xf32>
    %c0_7 = arith.constant 0 : index
    %c0_8 = arith.constant 0 : index
    %7 = vector.load %arg4[%c0_7, %c0_8] : memref<1x32xf32, #tpu.memory_space<vmem>>, vector<1x32xf32>
    %8 = vector.broadcast %7 : vector<1x32xf32> to vector<8x32xf32>
    %9 = arith.addf %6, %8 : vector<8x32xf32>
    %c0_9 = arith.constant 0 : index
    %c0_10 = arith.constant 0 : index
    %10 = vector.load %arg5[%c0_9, %c0_10] : memref<32x64xbf16, #tpu.memory_space<vmem>>, vector<32x64xbf16>
    %cst_11 = arith.constant dense<0.000000e+00> : vector<8x64xf32>
    %11 = tpu.matmul %3, %10, %cst_11 {dimension_numbers = #tpu.dot_dimension_numbers<[1], [0], [0], [1], [0, 0, 1, 1], [], []>} : vector<8x32xbf16>, vector<32x64xbf16>, vector<8x64xf32> -> vector<8x64xf32>
    %c0_12 = arith.constant 0 : index
    %c0_13 = arith.constant 0 : index
    %12 = vector.load %arg6[%c0_12, %c0_13] : memref<1x64xf32, #tpu.memory_space<vmem>>, vector<1x64xf32>
    %13 = vector.broadcast %12 : vector<1x64xf32> to vector<8x64xf32>
    %14 = arith.addf %11, %13 : vector<8x64xf32>
    %15 = arith.truncf %9 : vector<8x32xf32> to vector<8x32xbf16>
    %16 = arith.truncf %14 : vector<8x64xf32> to vector<8x64xbf16>
    %17 = vector.extract_strided_slice %16 {offsets = [0, 0], sizes = [8, 32], strides = [1, 1]} : vector<8x64xbf16> to vector<8x32xbf16>
    %18 = vector.extract_strided_slice %16 {offsets = [0, 32], sizes = [8, 32], strides = [1, 1]} : vector<8x64xbf16> to vector<8x32xbf16>
    %19 = vector.extract_strided_slice %15 {offsets = [0, 0], sizes = [8, 4], strides = [1, 1]} : vector<8x32xbf16> to vector<8x4xbf16>
    %20 = vector.extract_strided_slice %15 {offsets = [0, 4], sizes = [8, 4], strides = [1, 1]} : vector<8x32xbf16> to vector<8x4xbf16>
    %21 = vector.extract_strided_slice %15 {offsets = [0, 8], sizes = [8, 4], strides = [1, 1]} : vector<8x32xbf16> to vector<8x4xbf16>
    %22 = vector.extract_strided_slice %15 {offsets = [0, 12], sizes = [8, 4], strides = [1, 1]} : vector<8x32xbf16> to vector<8x4xbf16>
    %23 = vector.extract_strided_slice %15 {offsets = [0, 16], sizes = [8, 4], strides = [1, 1]} : vector<8x32xbf16> to vector<8x4xbf16>
    %24 = vector.extract_strided_slice %15 {offsets = [0, 20], sizes = [8, 4], strides = [1, 1]} : vector<8x32xbf16> to vector<8x4xbf16>
    %25 = vector.extract_strided_slice %15 {offsets = [0, 24], sizes = [8, 4], strides = [1, 1]} : vector<8x32xbf16> to vector<8x4xbf16>
    %26 = vector.extract_strided_slice %15 {offsets = [0, 28], sizes = [8, 4], strides = [1, 1]} : vector<8x32xbf16> to vector<8x4xbf16>
    %27 = vector.shape_cast %19 : vector<8x4xbf16> to vector<1x8x4xbf16>
    %28 = vector.shape_cast %20 : vector<8x4xbf16> to vector<1x8x4xbf16>
    %29 = vector.shape_cast %21 : vector<8x4xbf16> to vector<1x8x4xbf16>
    %30 = vector.shape_cast %22 : vector<8x4xbf16> to vector<1x8x4xbf16>
    %31 = vector.shape_cast %23 : vector<8x4xbf16> to vector<1x8x4xbf16>
    %32 = vector.shape_cast %24 : vector<8x4xbf16> to vector<1x8x4xbf16>
    %33 = vector.shape_cast %25 : vector<8x4xbf16> to vector<1x8x4xbf16>
    %34 = vector.shape_cast %26 : vector<8x4xbf16> to vector<1x8x4xbf16>
    %35 = tpu.concatenate %27, %28, %29, %30, %31, %32, %33, %34 in 0 : vector<1x8x4xbf16>, vector<1x8x4xbf16>, vector<1x8x4xbf16>, vector<1x8x4xbf16>, vector<1x8x4xbf16>, vector<1x8x4xbf16>, vector<1x8x4xbf16>, vector<1x8x4xbf16> -> vector<8x8x4xbf16>
    %36 = vector.extract_strided_slice %17 {offsets = [0, 0], sizes = [8, 4], strides = [1, 1]} : vector<8x32xbf16> to vector<8x4xbf16>
    %37 = vector.extract_strided_slice %17 {offsets = [0, 4], sizes = [8, 4], strides = [1, 1]} : vector<8x32xbf16> to vector<8x4xbf16>
    %38 = vector.extract_strided_slice %17 {offsets = [0, 8], sizes = [8, 4], strides = [1, 1]} : vector<8x32xbf16> to vector<8x4xbf16>
    %39 = vector.extract_strided_slice %17 {offsets = [0, 12], sizes = [8, 4], strides = [1, 1]} : vector<8x32xbf16> to vector<8x4xbf16>
    %40 = vector.extract_strided_slice %17 {offsets = [0, 16], sizes = [8, 4], strides = [1, 1]} : vector<8x32xbf16> to vector<8x4xbf16>
    %41 = vector.extract_strided_slice %17 {offsets = [0, 20], sizes = [8, 4], strides = [1, 1]} : vector<8x32xbf16> to vector<8x4xbf16>
    %42 = vector.extract_strided_slice %17 {offsets = [0, 24], sizes = [8, 4], strides = [1, 1]} : vector<8x32xbf16> to vector<8x4xbf16>
    %43 = vector.extract_strided_slice %17 {offsets = [0, 28], sizes = [8, 4], strides = [1, 1]} : vector<8x32xbf16> to vector<8x4xbf16>
    %44 = vector.shape_cast %36 : vector<8x4xbf16> to vector<1x8x4xbf16>
    %45 = vector.shape_cast %37 : vector<8x4xbf16> to vector<1x8x4xbf16>
    %46 = vector.shape_cast %38 : vector<8x4xbf16> to vector<1x8x4xbf16>
    %47 = vector.shape_cast %39 : vector<8x4xbf16> to vector<1x8x4xbf16>
    %48 = vector.shape_cast %40 : vector<8x4xbf16> to vector<1x8x4xbf16>
    %49 = vector.shape_cast %41 : vector<8x4xbf16> to vector<1x8x4xbf16>
    %50 = vector.shape_cast %42 : vector<8x4xbf16> to vector<1x8x4xbf16>
    %51 = vector.shape_cast %43 : vector<8x4xbf16> to vector<1x8x4xbf16>
    %52 = tpu.concatenate %44, %45, %46, %47, %48, %49, %50, %51 in 0 : vector<1x8x4xbf16>, vector<1x8x4xbf16>, vector<1x8x4xbf16>, vector<1x8x4xbf16>, vector<1x8x4xbf16>, vector<1x8x4xbf16>, vector<1x8x4xbf16>, vector<1x8x4xbf16> -> vector<8x8x4xbf16>
    %53 = vector.extract_strided_slice %18 {offsets = [0, 0], sizes = [8, 4], strides = [1, 1]} : vector<8x32xbf16> to vector<8x4xbf16>
    %54 = vector.extract_strided_slice %18 {offsets = [0, 4], sizes = [8, 4], strides = [1, 1]} : vector<8x32xbf16> to vector<8x4xbf16>
    %55 = vector.extract_strided_slice %18 {offsets = [0, 8], sizes = [8, 4], strides = [1, 1]} : vector<8x32xbf16> to vector<8x4xbf16>
    %56 = vector.extract_strided_slice %18 {offsets = [0, 12], sizes = [8, 4], strides = [1, 1]} : vector<8x32xbf16> to vector<8x4xbf16>
    %57 = vector.extract_strided_slice %18 {offsets = [0, 16], sizes = [8, 4], strides = [1, 1]} : vector<8x32xbf16> to vector<8x4xbf16>
    %58 = vector.extract_strided_slice %18 {offsets = [0, 20], sizes = [8, 4], strides = [1, 1]} : vector<8x32xbf16> to vector<8x4xbf16>
    %59 = vector.extract_strided_slice %18 {offsets = [0, 24], sizes = [8, 4], strides = [1, 1]} : vector<8x32xbf16> to vector<8x4xbf16>
    %60 = vector.extract_strided_slice %18 {offsets = [0, 28], sizes = [8, 4], strides = [1, 1]} : vector<8x32xbf16> to vector<8x4xbf16>
    %61 = vector.shape_cast %53 : vector<8x4xbf16> to vector<1x8x4xbf16>
    %62 = vector.shape_cast %54 : vector<8x4xbf16> to vector<1x8x4xbf16>
    %63 = vector.shape_cast %55 : vector<8x4xbf16> to vector<1x8x4xbf16>
    %64 = vector.shape_cast %56 : vector<8x4xbf16> to vector<1x8x4xbf16>
    %65 = vector.shape_cast %57 : vector<8x4xbf16> to vector<1x8x4xbf16>
    %66 = vector.shape_cast %58 : vector<8x4xbf16> to vector<1x8x4xbf16>
    %67 = vector.shape_cast %59 : vector<8x4xbf16> to vector<1x8x4xbf16>
    %68 = vector.shape_cast %60 : vector<8x4xbf16> to vector<1x8x4xbf16>
    %69 = tpu.concatenate %61, %62, %63, %64, %65, %66, %67, %68 in 0 : vector<1x8x4xbf16>, vector<1x8x4xbf16>, vector<1x8x4xbf16>, vector<1x8x4xbf16>, vector<1x8x4xbf16>, vector<1x8x4xbf16>, vector<1x8x4xbf16>, vector<1x8x4xbf16> -> vector<8x8x4xbf16>
    "tpu.trace_start"() <{level = 10 : i32, message = "hld,hsd->hls"}> : () -> ()
    %cst_14 = arith.constant dense<0.000000e+00> : vector<8x8x8xf32>
    %70 = tpu.matmul %35, %52, %cst_14 {dimension_numbers = #tpu.dot_dimension_numbers<[2], [2], [1], [1], [0, 0, 0, 1, 1, 1], [0], [0]>} : vector<8x8x4xbf16>, vector<8x8x4xbf16>, vector<8x8x8xf32> -> vector<8x8x8xf32>
    "tpu.trace_stop"() : () -> ()
    %cst_15 = arith.constant dense<0xFF800000> : vector<8x8xf32>
    %71 = vector.multi_reduction <maximumf>, %70, %cst_15 [2] : vector<8x8x8xf32> to vector<8x8xf32>
    %72 = vector.shape_cast %71 : vector<8x8xf32> to vector<8x8x1xf32>
    %73 = vector.broadcast %72 : vector<8x8x1xf32> to vector<8x8x8xf32>
    %74 = arith.subf %70, %73 : vector<8x8x8xf32>
    %75 = math.exp %74 : vector<8x8x8xf32>
    %cst_16 = arith.constant dense<0.000000e+00> : vector<8x8xf32>
    %76 = vector.multi_reduction <add>, %75, %cst_16 [2] : vector<8x8x8xf32> to vector<8x8xf32>
    %77 = vector.shape_cast %76 : vector<8x8xf32> to vector<8x8x1xf32>
    %78 = tpu.reciprocal %77 {approx = true} : vector<8x8x1xf32> -> vector<8x8x1xf32>
    %79 = vector.broadcast %78 : vector<8x8x1xf32> to vector<8x8x8xf32>
    %80 = arith.mulf %75, %79 : vector<8x8x8xf32>
    %81 = arith.truncf %80 : vector<8x8x8xf32> to vector<8x8x8xbf16>
    "tpu.trace_start"() <{level = 10 : i32, message = "hls,hsd->hld"}> : () -> ()
    %cst_17 = arith.constant dense<0.000000e+00> : vector<8x8x4xf32>
    %82 = tpu.matmul %81, %69, %cst_17 {dimension_numbers = #tpu.dot_dimension_numbers<[2], [1], [1], [2], [0, 0, 0, 1, 1, 2], [0], [0]>} : vector<8x8x8xbf16>, vector<8x8x4xbf16>, vector<8x8x4xf32> -> vector<8x8x4xf32>
    "tpu.trace_stop"() : () -> ()
    %83 = vector.extract_strided_slice %82 {offsets = [0, 0, 0], sizes = [1, 8, 4], strides = [1, 1, 1]} : vector<8x8x4xf32> to vector<1x8x4xf32>
    %84 = vector.shape_cast %83 : vector<1x8x4xf32> to vector<8x4xf32>
    %85 = vector.extract_strided_slice %82 {offsets = [1, 0, 0], sizes = [1, 8, 4], strides = [1, 1, 1]} : vector<8x8x4xf32> to vector<1x8x4xf32>
    %86 = vector.shape_cast %85 : vector<1x8x4xf32> to vector<8x4xf32>
    %87 = vector.extract_strided_slice %82 {offsets = [2, 0, 0], sizes = [1, 8, 4], strides = [1, 1, 1]} : vector<8x8x4xf32> to vector<1x8x4xf32>
    %88 = vector.shape_cast %87 : vector<1x8x4xf32> to vector<8x4xf32>
    %89 = vector.extract_strided_slice %82 {offsets = [3, 0, 0], sizes = [1, 8, 4], strides = [1, 1, 1]} : vector<8x8x4xf32> to vector<1x8x4xf32>
    %90 = vector.shape_cast %89 : vector<1x8x4xf32> to vector<8x4xf32>
    %91 = vector.extract_strided_slice %82 {offsets = [4, 0, 0], sizes = [1, 8, 4], strides = [1, 1, 1]} : vector<8x8x4xf32> to vector<1x8x4xf32>
    %92 = vector.shape_cast %91 : vector<1x8x4xf32> to vector<8x4xf32>
    %93 = vector.extract_strided_slice %82 {offsets = [5, 0, 0], sizes = [1, 8, 4], strides = [1, 1, 1]} : vector<8x8x4xf32> to vector<1x8x4xf32>
    %94 = vector.shape_cast %93 : vector<1x8x4xf32> to vector<8x4xf32>
    %95 = vector.extract_strided_slice %82 {offsets = [6, 0, 0], sizes = [1, 8, 4], strides = [1, 1, 1]} : vector<8x8x4xf32> to vector<1x8x4xf32>
    %96 = vector.shape_cast %95 : vector<1x8x4xf32> to vector<8x4xf32>
    %97 = vector.extract_strided_slice %82 {offsets = [7, 0, 0], sizes = [1, 8, 4], strides = [1, 1, 1]} : vector<8x8x4xf32> to vector<1x8x4xf32>
    %98 = vector.shape_cast %97 : vector<1x8x4xf32> to vector<8x4xf32>
    %99 = tpu.concatenate %84, %86, %88, %90, %92, %94, %96, %98 in 1 : vector<8x4xf32>, vector<8x4xf32>, vector<8x4xf32>, vector<8x4xf32>, vector<8x4xf32>, vector<8x4xf32>, vector<8x4xf32>, vector<8x4xf32> -> vector<8x32xf32>
    %100 = arith.truncf %99 : vector<8x32xf32> to vector<8x32xbf16>
    %c0_18 = arith.constant 0 : index
    %c0_19 = arith.constant 0 : index
    %101 = vector.load %arg7[%c0_18, %c0_19] : memref<32x32xbf16, #tpu.memory_space<vmem>>, vector<32x32xbf16>
    %cst_20 = arith.constant dense<0.000000e+00> : vector<8x32xf32>
    %102 = tpu.matmul %100, %101, %cst_20 {dimension_numbers = #tpu.dot_dimension_numbers<[1], [0], [0], [1], [0, 0, 1, 1], [], []>} : vector<8x32xbf16>, vector<32x32xbf16>, vector<8x32xf32> -> vector<8x32xf32>
    %c0_21 = arith.constant 0 : index
    %c0_22 = arith.constant 0 : index
    %103 = vector.load %arg8[%c0_21, %c0_22] : memref<1x32xf32, #tpu.memory_space<vmem>>, vector<1x32xf32>
    %104 = vector.broadcast %103 : vector<1x32xf32> to vector<8x32xf32>
    %105 = arith.addf %102, %104 : vector<8x32xf32>
    %106 = arith.addf %105, %1 : vector<8x32xf32>
    %cst_23 = arith.constant dense<0.000000e+00> : vector<8xf32>
    %107 = vector.multi_reduction <add>, %106, %cst_23 [1] : vector<8x32xf32> to vector<8xf32>
    %108 = vector.shape_cast %107 : vector<8xf32> to vector<8x1xf32>
    %cst_24 = arith.constant 3.200000e+01 : f32
    %109 = vector.broadcast %cst_24 : f32 to vector<8x1xf32>
    %110 = arith.divf %108, %109 : vector<8x1xf32>
    %111 = vector.broadcast %110 : vector<8x1xf32> to vector<8x32xf32>
    %112 = arith.subf %106, %111 : vector<8x32xf32>
    %113 = arith.mulf %112, %112 : vector<8x32xf32>
    %cst_25 = arith.constant dense<0.000000e+00> : vector<8xf32>
    %114 = vector.multi_reduction <add>, %113, %cst_25 [1] : vector<8x32xf32> to vector<8xf32>
    %115 = vector.shape_cast %114 : vector<8xf32> to vector<8x1xf32>
    %cst_26 = arith.constant 3.200000e+01 : f32
    %116 = vector.broadcast %cst_26 : f32 to vector<8x1xf32>
    %117 = arith.divf %115, %116 : vector<8x1xf32>
    %cst_27 = arith.constant 9.99999974E-6 : f32
    %118 = vector.broadcast %cst_27 : f32 to vector<8x1xf32>
    %119 = arith.addf %117, %118 : vector<8x1xf32>
    %120 = math.rsqrt %119 : vector<8x1xf32>
    %121 = vector.broadcast %120 : vector<8x1xf32> to vector<8x32xf32>
    %122 = arith.mulf %112, %121 : vector<8x32xf32>
    %c0_28 = arith.constant 0 : index
    %c0_29 = arith.constant 0 : index
    %123 = vector.load %arg9[%c0_28, %c0_29] : memref<1x32xf32, #tpu.memory_space<vmem>>, vector<1x32xf32>
    %124 = vector.broadcast %123 : vector<1x32xf32> to vector<8x32xf32>
    %125 = arith.mulf %122, %124 : vector<8x32xf32>
    %c0_30 = arith.constant 0 : index
    %c0_31 = arith.constant 0 : index
    %126 = vector.load %arg10[%c0_30, %c0_31] : memref<1x32xf32, #tpu.memory_space<vmem>>, vector<1x32xf32>
    %127 = vector.broadcast %126 : vector<1x32xf32> to vector<8x32xf32>
    %128 = arith.addf %125, %127 : vector<8x32xf32>
    %c0_32 = arith.constant 0 : index
    %c0_33 = arith.constant 0 : index
    %c0_34 = arith.constant 0 : index
    %129 = vector.load %arg11[%c0_32, %c0_33, %c0_34] : memref<1x8x32xf32, #tpu.memory_space<vmem>>, vector<1x8x32xf32>
    %130 = vector.shape_cast %129 : vector<1x8x32xf32> to vector<8x32xf32>
    %131 = vector.shape_cast %128 : vector<8x32xf32> to vector<1x8x32xf32>
    tpu.vector_store %arg11[%c0_32, %c0_33, %c0_34], %131 {strides = array<i32>} : memref<1x8x32xf32, #tpu.memory_space<vmem>>, vector<1x8x32xf32>,
    return
  }
  func.func @transform_0(%arg0: i32) -> (i32, i32, i32) {
    %c0_i32 = arith.constant 0 : i32
    %c0_i32_0 = arith.constant 0 : i32
    %c0_i32_1 = arith.constant 0 : i32
    return %arg0, %c0_i32, %c0_i32_0 : i32, i32, i32
  }
  func.func @transform_1(%arg0: i32) -> (i32, i32, i32) {
    %c0_i32 = arith.constant 0 : i32
    %c0_i32_0 = arith.constant 0 : i32
    %c0_i32_1 = arith.constant 0 : i32
    return %arg0, %c0_i32, %c0_i32_0 : i32, i32, i32
  }
  func.func @transform_2(%arg0: i32) -> (i32, i32) {
    %c0_i32 = arith.constant 0 : i32
    %c0_i32_0 = arith.constant 0 : i32
    %c0_i32_1 = arith.constant 0 : i32
    return %c0_i32, %c0_i32_0 : i32, i32
  }
  func.func @transform_3(%arg0: i32) -> (i32, i32) {
    %c0_i32 = arith.constant 0 : i32
    %c0_i32_0 = arith.constant 0 : i32
    %c0_i32_1 = arith.constant 0 : i32
    return %c0_i32, %c0_i32_0 : i32, i32
  }
  func.func @transform_4(%arg0: i32) -> (i32, i32) {
    %c0_i32 = arith.constant 0 : i32
    %c0_i32_0 = arith.constant 0 : i32
    %c0_i32_1 = arith.constant 0 : i32
    return %c0_i32, %c0_i32_0 : i32, i32
  }
  func.func @transform_5(%arg0: i32) -> (i32, i32) {
    %c0_i32 = arith.constant 0 : i32
    %c0_i32_0 = arith.constant 0 : i32
    %c0_i32_1 = arith.constant 0 : i32
    return %c0_i32, %c0_i32_0 : i32, i32
  }
  func.func @transform_6(%arg0: i32) -> (i32, i32) {
    %c0_i32 = arith.constant 0 : i32
    %c0_i32_0 = arith.constant 0 : i32
    %c0_i32_1 = arith.constant 0 : i32
    return %c0_i32, %c0_i32_0 : i32, i32
  }
  func.func @transform_7(%arg0: i32) -> (i32, i32) {
    %c0_i32 = arith.constant 0 : i32
    %c0_i32_0 = arith.constant 0 : i32
    %c0_i32_1 = arith.constant 0 : i32
    return %c0_i32, %c0_i32_0 : i32, i32
  }
  func.func @transform_8(%arg0: i32) -> (i32, i32) {
    %c0_i32 = arith.constant 0 : i32
    %c0_i32_0 = arith.constant 0 : i32
    %c0_i32_1 = arith.constant 0 : i32
    return %c0_i32, %c0_i32_0 : i32, i32
  }
  func.func @transform_9(%arg0: i32) -> (i32, i32) {
    %c0_i32 = arith.constant 0 : i32
    %c0_i32_0 = arith.constant 0 : i32
    %c0_i32_1 = arith.constant 0 : i32
    return %c0_i32, %c0_i32_0 : i32, i32
  }
  func.func @transform_10(%arg0: i32) -> (i32, i32, i32) {
    %c0_i32 = arith.constant 0 : i32
    %c0_i32_0 = arith.constant 0 : i32
    %c0_i32_1 = arith.constant 0 : i32
    return %arg0, %c0_i32, %c0_i32_0 : i32, i32, i32
  }
}

</mosaic_0001>

<bundles_post_ra>
// kernel: cross_attention_forward.1
= control target key start
LH: loop header
LB: loop body
LE: loop exit
PB: predicated region body
PF: predicated region fallthrough
CT: control target
= control target key end

     0   :  { %15 = vsyncpa [#allocation3], 0  ;;  %s2447_s0 = inlined_call_operand.vmem [shape: f32[2,8,32], index: 0, kind: input, shape index: {}]   ;;  %s2448_s1 = inlined_call_operand.vmem [shape: bf16[2,8,32], index: 1, kind: input, shape index: {}]   ;;  %s2449_s2 = inlined_call_operand.vmem [shape: bf16[32,32], index: 2, kind: input, shape index: {}]   ;;  %s2450_s3 = inlined_call_operand.vmem [shape: f32[1,32], index: 3, kind: input, shape index: {}]   ;;  %s2451_s4 = inlined_call_operand.vmem [shape: bf16[32,64], index: 4, kind: input, shape index: {}]   ;;  %s2452_s5 = inlined_call_operand.hbm [shape: f32[1,64], index: 5, kind: input, shape index: {}]   ;;  %s2453_s6 = inlined_call_operand.vmem [shape: bf16[32,32], index: 6, kind: input, shape index: {}]   ;;  %s2454_s7 = inlined_call_operand.hbm [shape: f32[1,32], index: 7, kind: input, shape index: {}]   ;;  %s2455_s8 = inlined_call_operand.vmem [shape: f32[1,32], index: 8, kind: input, shape index: {}]   ;;  %s2456_s9 = inlined_call_operand.hbm [shape: f32[1,32], index: 9, kind: input, shape index: {}]   ;;  %s2457_s10 = inlined_call_operand.vmem [shape: f32[2,8,32], index: 10, kind: output, shape index: {}]  }
   0x1   :  { %16 = vsyncpa [#allocation5], 0  ;;  %s2137_s13 = smov 0  }
   0x2 LB: > { %s2143_s14 = sadd.s32 4294967295, %s2060_s13   ;;  %p1667_p0 = scmp.ge.s32.totalorder %s2060_s13, 1  ;;  %s2060_s13 = sphi %s2137_s13, %s22_s13  }
   0x3   : > { %p273_p1 = scmp.lt.s32.totalorder %s2060_s13, 3  ;;  %p2458_p2 = scmp.eq.s32.totalorder %s2143_s14, 0 }
   0x4   : > { %s2062_s16 = smov [#allocation4]   ;;  %s2063_s18 = smov [#allocation2]  }
   0x5   : > { %p2148_p3 = pnand %p1667_p0, %p273_p1  ;;  %s309_s17 = sshll.u32 %s2062_s16, 4  ;;  %s310_s17 = int_to_ptr.vmem [resolvable:$true] %s309_s17 }
   0x6   : > { %s295_s19 = sshll.u32 %s2063_s18, 4  ;;  %s2064_s20 = smov [#allocation6]   ;;  %s296_s19 = int_to_ptr.vmem [resolvable:$true] %s295_s19 }
   0x7   : > { %p1884_p4 = pneg %p2148_p3  ;;  %s323_s21 = sshll.u32 %s2064_s20, 4  ;;  %s2160_s21 = int_to_ptr.vmem [resolvable:$true] %s323_s21 }
   0x8   : > { %s1979_s23 = scalar_lea.vmem %s310_s17, 16  ;;  %s1986_s24 = scalar_lea.vmem %s310_s17, 32 }
   0x9   : > { %p2156_p5 = pnand %p2458_p2, %p1884_p4  ;;  %p1980_p7 = scmp.ne.s32.totalorder %s310_s17, %s1979_s23 }
   0xa   : > { %p1987_p10 = scmp.lt.s32.totalorder %s310_s17, %s310_s17  ;;  %p1988_p11 = scmp.lt.s32.totalorder %s1986_s24, %s1979_s23 }
   0xb   : > { %p1970_p6 = pneg %p2156_p5 }
   0xc   : > { %p1989_p12 = por %p1988_p11, %p1987_p10 }
   0xd   : > { %p1982_p8 = pnand %p1980_p7, %p1970_p6 }
   0xf   : > { %p1983_p9 = pneg %p1982_p8 }
  0x11   : > { %p1990_p13 = pnand %p1989_p12, %p1983_p9 }
  0x13   : > { %1993 = shalt.err (!%p1990_p13)
}
  0x14   : > { %1890 = dma.hbm_to_vmem [thread:$0]  (!%p2156_p5), %s2454_s7, 16, %s310_s17, [#allocation5]  }
  0x15   : > { %s2005_s27 = scalar_lea.vmem %s296_s19, 16  ;;  %s2012_s28 = scalar_lea.vmem %s296_s19, 32 }
  0x16   : > { %p2006_p0 = scmp.ne.s32.totalorder %s296_s19, %s2005_s27  ;;  %p2013_p7 = scmp.lt.s32.totalorder %s296_s19, %s296_s19 }
  0x17   : > { %p2014_p8 = scmp.lt.s32.totalorder %s2012_s28, %s2005_s27 }
  0x18   : > { %p2008_p1 = pnand %p2006_p0, %p1970_p6 }
  0x19   : > { %p2015_p2 = por %p2014_p8, %p2013_p7 }
  0x1a   : > { %p2009_p4 = pneg %p2008_p1 }
  0x1c   : > { %p2016_p10 = pnand %p2015_p2, %p2009_p4 }
  0x1e   : > { %2019 = shalt.err (!%p2016_p10)
}
  0x1f   : > { %1887 = dma.hbm_to_vmem [thread:$0]  (!%p2156_p5), %s2452_s5, 16, %s296_s19, [#allocation3]  }
  0x20   : > { %s2031_s11 = scalar_lea.vmem %s2160_s21, 16  ;;  %s2038_s12 = scalar_lea.vmem %s2160_s21, 32 }
  0x21   : > { %p2032_p9 = scmp.ne.s32.totalorder %s2160_s21, %s2031_s11  ;;  %p2039_p2 = scmp.lt.s32.totalorder %s2160_s21, %s2160_s21 }
  0x22   : > { %p2040_p13 = scmp.lt.s32.totalorder %s2038_s12, %s2031_s11 }
  0x23   : > { %p2034_p11 = pnand %p2032_p9, %p1970_p6 }
  0x24   : > { %p2041_p0 = por %p2040_p13, %p2039_p2 }
  0x25   : > { %p2035_p12 = pneg %p2034_p11 }
  0x27   : > { %p2042_p1 = pnand %p2041_p0, %p2035_p12 }
  0x29   : > { %2045 = shalt.err (!%p2042_p1)
}
  0x2a   : > { %1893 = dma.hbm_to_vmem [thread:$0]  (!%p2156_p5), %s2456_s9, 16, %s2160_s21, [#allocation5]  }
  0x2b   : > { %350 = sbr.rel (%p2148_p3) target bundleno = 1776 (0x6f0), region = 60  ;;  %p2461_p6 = scmp.eq.s32.totalorder (!%p2148_p3), %s2143_s14, 0 }
  0x30   : > { %2051 = dma.done.wait (%p2461_p6), [#allocation3], 16   ;;  %p2462_p4 = pmov %p2461_p6 }
  0x32   : > { %2053 = vsyncadd (%p2462_p4), [#allocation3], 4294967280  ;;  %p2463_p7 = pmov %p2462_p4 }
  0x33   : > { %p2464_p8 = pmov %p2462_p4 }
  0x34   : > { %2055 = dma.done.wait (%p2463_p7), [#allocation5], 32  }
  0x35   : > { %2057 = vsyncadd (%p2464_p8), [#allocation5], 4294967264  ;;  %p398_p10 = scmp.lt.s32.totalorder %s2143_s14, 1  ;;  %v2065_v0 = vmov 0.0   ;;  %vm2066_vm0 = vmmov 0   ;;  %v1928_v1 = vld [vmem:[%s2449_s2 + $0x8] sm:$0xff]  }
  0x36   : > { %1752 = vmatprep.subr.bf16.mxu0 %v2065_v0  ;;  %1760 = vmatprep.subr.bf16.mxu1 %v2065_v0  ;;  %v1929_v2 = vld [vmem:[%s2451_s4 + $0x8] sm:$0xff]   ;;  %v1930_v3 = vld [vmem:[%s2449_s2] sm:$0xff]   ;;  %vm437_vm1 = vcmask 261120   ;;  %vm579_vm2 = vcmask 31744   ;;  %s2067_s18 = smov 124   ;;  %s2068_s19 = smov 116  }
  0x37   : > { %1756 = vmatprep.mubr.msk.bf16.mxu0 %vm2066_vm0, %v2065_v0  ;;  %1764 = vmatprep.mubr.msk.bf16.mxu1 %vm2066_vm0, %v2065_v0  ;;  %s2466_s14 = smov (!%p398_p10, %s2143_s14), 1  ;;  %v1931_v4 = vld [vmem:[%s2451_s4] sm:$0xff]   ;;  %s2069_s20 = smov 120   ;;  %vm1050_vm3 = vcmask 1043456   ;;  %vm948_vm4 = vcmask 64512   ;;  %vm1460_vm5 = vcmask 97280  }
  0x38   : > { %s1676_s15 = sshll.u32 %s2466_s14, 3  ;;  %s1677_s25 = sshll.u32 %s2466_s14, 2  ;;  %1753 = vmatpush3.bf16.msra.mxu0 %v1928_v1  ;;  %1761 = vmatpush3.bf16.msra.mxu1 %v1929_v2  ;;  %v1679_v8 = vld [vmem:[%s2450_s3] ss:$0 sm:$0xff]  ;;  %vm1462_vm6 = vcmask 130048   ;;  %vm1464_vm7 = vcmask 162816  }
  0x39   : > { %s401_s24 = scalar_lea.vmem %s2447_s0, %s1676_s15  ;;  %1754 = vmatprep.subr.bf16.mxu0 %v2065_v0  ;;  %1762 = vmatprep.subr.bf16.mxu1 %v2065_v0  ;;  %s405_s12 = scalar_lea.vmem %s2448_s1, %s1677_s25  ;;  %v1683_v9 = vld [vmem:[#allocation2] ss:$0 sm:$0xff]  ;;  %vm1466_vm8 = vcmask 195584   ;;  %vm1468_vm9 = vcmask 228352  }
  0x3a   : > { %v2235_v5 = vld [vmem:[%s401_s24] sm:$0xff]  ;;  %s2070_s21 = smov 112   ;;  %s2071_s22 = smov 108  }
  0x3b   : > { %v413_v6 = vpack.c.bf16 %v2235_v5, %v2235_v5  ;;  %v412_v7 = vld [vmem:[%s405_s12] sm:$0xf]  ;;  %s2072_s23 = smov 104   ;;  %s2073_s24 = smov 100  }
  0x3c   : > { %1755 = vmatpush3.bf16.msra.mxu0 %v1930_v3  ;;  %1763 = vmatpush3.bf16.msra.mxu1 %v1931_v4  ;;  %s2074_s25 = smov 96   ;;  %s2075_s26 = smov 4  }
  0x3d   : > { %1768 = vmatprep.subr.bf16.mxu0 %v2065_v0  ;;  %1774 = vmatprep.subr.bf16.mxu1 %v2065_v0  ;;  %s2076_s27 = smov 8   ;;  %s2077_s28 = smov 12  }
  0x3e   : > { %s2078_s16 = smov 16   ;;  %s2079_s17 = smov 20  }
  0x3f   : > { %1757 = vmatmul.mubr.msk.bf16.vlgmr.msra.gmra.mxu0 %vm437_vm1, %v413_v6  ;;  %1765 = vmatmul.mubr.msk.bf16.vlgmr.msra.gmra.mxu1 %vm437_vm1, %v412_v7 }
  0x40   : > { %1770 = vmatprep.mubr.msk.bf16.mxu0 %vm2066_vm0, %v2065_v0  ;;  %1776 = vmatprep.mubr.msk.bf16.mxu1 %vm2066_vm0, %v2065_v0 }
  0xff   : > { %v475_v10 = vpop.f32.mrf.mxu0  ;;  %v541_v12 = vpop.f32.mrf.mxu1 }
 0x100   : > { %v476_v11 = vadd.f32 %v1679_v8, %v475_v10  ;;  %v542_v13 = vadd.f32 %v1683_v9, %v541_v12 }
 0x101   : > { %v1758_v14 = vpop.f32.mrf.mxu0  ;;  %v1766_v16 = vpop.f32.mrf.mxu1 }
 0x102   : > { %v547_v15 = vpack.c.bf16 %v476_v11, %v476_v11  ;;  %v548_v17 = vpack.c.bf16 %v542_v13, %v542_v13 }
 0x103   : > { %v478_v18 = vpop.f32.mrf.mxu0  ;;  %v544_v19 = vpop.f32.mrf.mxu1 }
 0x104   : > { %550 = vrot.lane.b32.xlu1 %v547_v15, %s2067_s18  ;;  %565 = vrot.lane.b32.xlu0 %v548_v17, %s2067_s18  ;;  %v584_v21 = vsel %vm579_vm2, %v548_v17, 0  ;;  %s2080_s18 = smov 24  }
 0x105   : > { %v1759_v20 = vpop.f32.mrf.mxu0  ;;  %v1767_v22 = vpop.f32.mrf.mxu1  ;;  %1769 = vmatpush3.bf16.xpose.msra.mxu0 %v584_v21 }
 0x106   : > { %1780 = vmatprep.subr.bf16.mxu0 %v2065_v0 }
 0x108   : > { %569 = vrot.lane.b32.xlu1 %v548_v17, %s2068_s19  ;;  %567 = vrot.lane.b32.xlu0 %v548_v17, %s2069_s20 }
 0x10c   : > { %571 = vrot.lane.b32.xlu1 %v548_v17, %s2070_s21  ;;  %552 = vrot.lane.b32.xlu0 %v547_v15, %s2069_s20 }
 0x10d   : > { %1771 = vmatmul.mubr.msk.bf16.vlgmr.msra.gmra.mxu0 %vm579_vm2, %v547_v15 }
 0x10e   : > { %1782 = vmatprep.mubr.msk.bf16.mxu0 %vm2066_vm0, %v2065_v0 }
 0x110   : > { %573 = vrot.lane.b32.xlu1 %v548_v17, %s2071_s22  ;;  %554 = vrot.lane.b32.xlu0 %v547_v15, %s2068_s19  ;;  %s2081_s19 = smov 28  }
 0x114   : > { %575 = vrot.lane.b32.xlu1 %v548_v17, %s2072_s23  ;;  %556 = vrot.lane.b32.xlu0 %v547_v15, %s2070_s21 }
 0x118   : > { %577 = vrot.lane.b32.xlu1 %v548_v17, %s2073_s24  ;;  %558 = vrot.lane.b32.xlu0 %v547_v15, %s2071_s22 }
 0x11c   : > { %562 = vrot.lane.b32.xlu1 %v547_v15, %s2073_s24  ;;  %560 = vrot.lane.b32.xlu0 %v547_v15, %s2072_s23  ;;  %s409_s24 = scalar_lea.vmem %s2457_s10, %s1676_s15 }
 0x120   : > { %1045 = vrot.lane.b32.xlu1 %v548_v17, %s2074_s25 }
 0x176   : > { %v551_v23 = vpop.permute.xlu1 %550  ;;  %v2259_v24 = vpop.permute.xlu0 %565 }
 0x177   : > { %v630_v25 = vsel %vm579_vm2, %v2259_v24, 0 }
 0x178   : > { %1775 = vmatpush3.bf16.xpose.msra.mxu1 %v630_v25 }
 0x179   : > { %1786 = vmatprep.subr.bf16.mxu1 %v2065_v0 }
 0x17a   : > { %v2263_v26 = vpop.permute.xlu1 %569  ;;  %v2266_v27 = vpop.permute.xlu0 %567 }
 0x17b   : > { %v676_v28 = vsel %vm579_vm2, %v2266_v27, 0  ;;  %v722_v31 = vsel %vm579_vm2, %v2263_v26, 0 }
 0x17c   : > { %1781 = vmatpush3.bf16.xpose.msra.mxu0 %v676_v28 }
 0x17d   : > { %1792 = vmatprep.subr.bf16.mxu0 %v2065_v0 }
 0x17e   : > { %v2270_v29 = vpop.permute.xlu1 %571  ;;  %v553_v30 = vpop.permute.xlu0 %552 }
 0x17f   : > { %1777 = vmatmul.mubr.msk.bf16.vlgmr.msra.gmra.mxu1 %vm579_vm2, %v551_v23  ;;  %v768_v34 = vsel %vm579_vm2, %v2270_v29, 0 }
 0x180   : > { %1787 = vmatpush3.bf16.xpose.msra.mxu1 %v722_v31  ;;  %1788 = vmatprep.mubr.msk.bf16.mxu1 %vm2066_vm0, %v2065_v0 }
 0x181   : > { %1798 = vmatprep.subr.bf16.mxu1 %v2065_v0 }
 0x182   : > { %v2278_v32 = vpop.permute.xlu1 %573  ;;  %v555_v33 = vpop.permute.xlu0 %554 }
 0x183   : > { %1783 = vmatmul.mubr.msk.bf16.vlgmr.msra.gmra.mxu0 %vm579_vm2, %v553_v30  ;;  %v814_v37 = vsel %vm579_vm2, %v2278_v32, 0 }
 0x184   : > { %1793 = vmatpush3.bf16.xpose.msra.mxu0 %v768_v34  ;;  %1794 = vmatprep.mubr.msk.bf16.mxu0 %vm2066_vm0, %v2065_v0 }
 0x185   : > { %1804 = vmatprep.subr.bf16.mxu0 %v2065_v0 }
 0x186   : > { %v2286_v35 = vpop.permute.xlu1 %575  ;;  %v557_v36 = vpop.permute.xlu0 %556 }
 0x187   : > { %1789 = vmatmul.mubr.msk.bf16.vlgmr.msra.gmra.mxu1 %vm579_vm2, %v555_v33  ;;  %v860_v39 = vsel %vm579_vm2, %v2286_v35, 0 }
 0x188   : > { %1799 = vmatpush3.bf16.xpose.msra.mxu1 %v814_v37  ;;  %1800 = vmatprep.mubr.msk.bf16.mxu1 %vm2066_vm0, %v2065_v0 }
 0x189   : > { %1810 = vmatprep.subr.bf16.mxu1 %v2065_v0 }
 0x18a   : > { %v2294_v38 = vpop.permute.xlu1 %577  ;;  %v559_v40 = vpop.permute.xlu0 %558 }
 0x18b   : > { %1795 = vmatmul.mubr.msk.bf16.vlgmr.msra.gmra.mxu0 %vm579_vm2, %v557_v36  ;;  %v906_v42 = vsel %vm579_vm2, %v2294_v38, 0 }
 0x18c   : > { %1805 = vmatpush3.bf16.xpose.msra.mxu0 %v860_v39  ;;  %1806 = vmatprep.mubr.msk.bf16.mxu0 %vm2066_vm0, %v2065_v0 }
 0x18d   : > { %1816 = vmatprep.subr.bf16.mxu0 %v2065_v0 }
 0x18e   : > { %v563_v41 = vpop.permute.xlu1 %562  ;;  %v561_v44 = vpop.permute.xlu0 %560 }
 0x18f   : > { %1801 = vmatmul.mubr.msk.bf16.vlgmr.msra.gmra.mxu1 %vm579_vm2, %v559_v40 }
 0x190   : > { %1811 = vmatpush3.bf16.xpose.msra.mxu1 %v906_v42  ;;  %1812 = vmatprep.mubr.msk.bf16.mxu1 %vm2066_vm0, %v2065_v0 }
 0x191   : > { %1822 = vmatprep.subr.bf16.mxu1 %v2065_v0 }
 0x192   : > { %v1046_v43 = vpop.permute.xlu1 %1045 }
 0x193   : > { %v1052_v45 = vsel %vm1050_vm3, %v1046_v43, 0  ;;  %1807 = vmatmul.mubr.msk.bf16.vlgmr.msra.gmra.mxu0 %vm579_vm2, %v561_v44 }
 0x194   : > { %1817 = vmatpush3.bf16.msra.mxu0 %v1052_v45  ;;  %1818 = vmatprep.mubr.msk.bf16.mxu0 %vm2066_vm0, %v2065_v0 }
 0x195   : > { %1828 = vmatprep.subr.bf16.mxu0 %v2065_v0 }
 0x197   : > { %1813 = vmatmul.mubr.msk.bf16.vlgmr.msra.gmra.mxu1 %vm579_vm2, %v563_v41 }
 0x198   : > { %1824 = vmatprep.mubr.msk.bf16.mxu1 %vm2066_vm0, %v2065_v0 }
 0x1cd   : > { %v620_v46 = vpop.f32.mrf.mxu0 }
 0x1ce   : > { %v949_v47 = vsel %vm948_vm4, %v620_v46, -inf }
 0x1cf   : > { %950 = vmax.xlane.f32.xlu0 %v949_v47  ;;  %v1772_v48 = vpop.f32.mrf.mxu0 }
 0x1d1   : > { %v623_v49 = vpop.f32.mrf.mxu0 }
 0x1d3   : > { %v1773_v50 = vpop.f32.mrf.mxu0 }
 0x23f   : > { %v666_v51 = vpop.f32.mrf.mxu1 }
 0x240   : > { %v952_v52 = vsel %vm948_vm4, %v666_v51, -inf }
 0x241   : > { %953 = vmax.xlane.f32.xlu1 %v952_v52  ;;  %v1778_v53 = vpop.f32.mrf.mxu1 }
 0x243   : > { %v669_v54 = vpop.f32.mrf.mxu1  ;;  %v712_v55 = vpop.f32.mrf.mxu0 }
 0x244   : > { %v955_v56 = vsel %vm948_vm4, %v712_v55, -inf }
 0x245   : > { %v1779_v57 = vpop.f32.mrf.mxu1  ;;  %956 = vmax.xlane.f32.xlu0 %v955_v56  ;;  %v1784_v58 = vpop.f32.mrf.mxu0 }
 0x247   : > { %v715_v59 = vpop.f32.mrf.mxu0  ;;  %v758_v60 = vpop.f32.mrf.mxu1 }
 0x248   : > { %v958_v61 = vsel %vm948_vm4, %v758_v60, -inf }
 0x249   : > { %v1790_v62 = vpop.f32.mrf.mxu1  ;;  %959 = vmax.xlane.f32.xlu0 %v958_v61  ;;  %v1785_v63 = vpop.f32.mrf.mxu0 }
 0x24b   : > { %v761_v1 = vpop.f32.mrf.mxu1  ;;  %v2321_v2 = vpop.f32.mrf.mxu0 }
 0x24c   : > { %v961_v3 = vsel %vm948_vm4, %v2321_v2, -inf }
 0x24d   : > { %v1791_v4 = vpop.f32.mrf.mxu1  ;;  %962 = vmax.xlane.f32.xlu1 %v961_v3  ;;  %v1796_v6 = vpop.f32.mrf.mxu0 }
 0x24f   : > { %v807_v7 = vpop.f32.mrf.mxu0  ;;  %v2325_v8 = vpop.f32.mrf.mxu1 }
 0x250   : > { %v964_v9 = vsel %vm948_vm4, %v2325_v8, -inf }
 0x251   : > { %v1802_v10 = vpop.f32.mrf.mxu1  ;;  %965 = vmax.xlane.f32.xlu0 %v964_v9  ;;  %v1797_v11 = vpop.f32.mrf.mxu0 }
 0x253   : > { %v853_v12 = vpop.f32.mrf.mxu1  ;;  %v896_v13 = vpop.f32.mrf.mxu0 }
 0x254   : > { %v967_v14 = vsel %vm948_vm4, %v896_v13, -inf }
 0x255   : > { %v1803_v15 = vpop.f32.mrf.mxu1  ;;  %968 = vmax.xlane.f32.xlu1 %v967_v14  ;;  %v1808_v16 = vpop.f32.mrf.mxu0 }
 0x257   : > { %v942_v17 = vpop.f32.mrf.mxu1  ;;  %v899_v18 = vpop.f32.mrf.mxu0 }
 0x258   : > { %v970_v19 = vsel %vm948_vm4, %v942_v17, -inf  ;;  %v951_v25 = vpop.xlane.xlu0 %950 }
 0x259   : > { %v1814_v20 = vpop.f32.mrf.mxu1  ;;  %971 = vmax.xlane.f32.xlu0 %v970_v19  ;;  %v1809_v21 = vpop.f32.mrf.mxu0  ;;  %v973_v28 = vsub.f32 %v620_v46, %v951_v25 }
 0x25b   : > { %v945_v22 = vpop.f32.mrf.mxu1  ;;  %v981_v30 = vmul.f32 1.442695, %v973_v28 }
 0x25d   : > { %v1815_v23 = vpop.f32.mrf.mxu1  ;;  %1934 = vpow2.f32 %v981_v30 }
 0x266   : > { %1142 = vrot.lane.b32.xlu1 %v2266_v27, %s2074_s25 }
 0x26a   : > { %1190 = vrot.lane.b32.xlu1 %v2263_v26, %s2074_s25  ;;  %v2337_v31 = vpop.eup %1934 }
 0x26b   : > { %v997_v33 = vsel %vm948_vm4, %v2337_v31, 0.0 }
 0x26f   : > { %1094 = vrot.lane.b32.xlu0 %v2259_v24, %s2074_s25 }
 0x28e   : > { %998 = vadd.xlane.f32.xlu1 %v997_v33 }
 0x2ca   : > { %v954_v34 = vpop.xlane.xlu1 %953 }
 0x2cb   : > { %v974_v36 = vsub.f32 %v666_v51, %v954_v34 }
 0x2cd   : > { %v983_v37 = vmul.f32 1.442695, %v974_v36 }
 0x2ce   : > { %v957_v27 = vpop.xlane.xlu0 %956 }
 0x2cf   : > { %1936 = vpow2.f32 %v983_v37  ;;  %v975_v39 = vsub.f32 %v712_v55, %v957_v27 }
 0x2d1   : > { %v985_v26 = vmul.f32 1.442695, %v975_v39 }
 0x2d2   : > { %v960_v40 = vpop.xlane.xlu0 %959 }
 0x2d3   : > { %1938 = vpow2.f32 %v985_v26  ;;  %v976_v24 = vsub.f32 %v758_v60, %v960_v40 }
 0x2d5   : > { %v987_v41 = vmul.f32 1.442695, %v976_v24 }
 0x2d6   : > { %v963_v52 = vpop.xlane.xlu1 %962 }
 0x2d7   : > { %1940 = vpow2.f32 %v987_v41  ;;  %v977_v53 = vsub.f32 %v2321_v2, %v963_v52 }
 0x2d9   : > { %v989_v56 = vmul.f32 1.442695, %v977_v53 }
 0x2da   : > { %v966_v44 = vpop.xlane.xlu0 %965 }
 0x2db   : > { %v978_v55 = vsub.f32 %v2325_v8, %v966_v44  ;;  %1942 = vpow2.f32 %v989_v56 }
 0x2dc   : > { %v2341_v42 = vpop.eup %1936 }
 0x2dd   : > { %v1000_v43 = vsel %vm948_vm4, %v2341_v42, 0.0  ;;  %v991_v58 = vmul.f32 1.442695, %v978_v55 }
 0x2de   : > { %1001 = vadd.xlane.f32.xlu0 %v1000_v43  ;;  %v969_v54 = vpop.xlane.xlu1 %968 }
 0x2df   : > { %v979_v57 = vsub.f32 %v896_v13, %v969_v54  ;;  %1944 = vpow2.f32 %v991_v58 }
 0x2e0   : > { %v2345_v45 = vpop.eup %1938 }
 0x2e1   : > { %v1003_v46 = vsel %vm948_vm4, %v2345_v45, 0.0  ;;  %v993_v59 = vmul.f32 1.442695, %v979_v57 }
 0x2e2   : > { %v972_v47 = vpop.xlane.xlu0 %971  ;;  %1004 = vadd.xlane.f32.xlu1 %v1003_v46  ;;  %v1143_v62 = vpop.permute.xlu1 %1142 }
 0x2e3   : > { %v980_v60 = vsub.f32 %v942_v17, %v972_v47  ;;  %1946 = vpow2.f32 %v993_v59  ;;  %v1148_v12 = vsel %vm1050_vm3, %v1143_v62, 0 }
 0x2e4   : > { %v2349_v48 = vpop.eup %1940 }
 0x2e5   : > { %v1006_v49 = vsel %vm948_vm4, %v2349_v48, 0.0  ;;  %v995_v61 = vmul.f32 1.442695, %v980_v60 }
 0x2e6   : > { %1007 = vadd.xlane.f32.xlu0 %v1006_v49  ;;  %v1095_v50 = vpop.permute.xlu0 %1094  ;;  %v1191_v63 = vpop.permute.xlu1 %1190 }
 0x2e7   : > { %v1100_v51 = vsel %vm1050_vm3, %v1095_v50, 0  ;;  %1948 = vpow2.f32 %v995_v61  ;;  %v1196_v20 = vsel %vm1050_vm3, %v1191_v63, 0 }
 0x2e8   : > { %1823 = vmatpush3.bf16.msra.mxu1 %v1100_v51 }
 0x2e9   : > { %1834 = vmatprep.subr.bf16.mxu1 %v2065_v0 }
 0x2f3   : > { %1286 = vrot.lane.b32.xlu1 %v2278_v32, %s2074_s25  ;;  %v2361_v32 = vpop.eup %1942 }
 0x2f4   : > { %v1009_v1 = vsel %vm948_vm4, %v2361_v32, 0.0 }
 0x2fc   : > { %1238 = vrot.lane.b32.xlu0 %v2270_v29, %s2074_s25  ;;  %v2363_v29 = vpop.eup %1944 }
 0x2fd   : > { %v2367_v2 = vpop.eup %1946  ;;  %v1012_v4 = vsel %vm948_vm4, %v2363_v29, 0.0 }
 0x2fe   : > { %v1015_v6 = vsel %vm948_vm4, %v2367_v2, 0.0  ;;  %v2373_v7 = vpop.eup %1948 }
 0x2ff   : > { %v1018_v8 = vsel %vm948_vm4, %v2373_v7, 0.0 }
 0x317   : > { %1010 = vadd.xlane.f32.xlu1 %v1009_v1  ;;  %v999_v3 = vpop.xlane.xlu1 %998 }
 0x318   : > { %1950 = vrcp.f32 %v999_v3  ;;  %v1932_v3 = vld [vmem:[%s2453_s6 + $0x8] sm:$0xff]  }
 0x31b   : > { %1013 = vadd.xlane.f32.xlu0 %v1012_v4  ;;  %1016 = vadd.xlane.f32.xlu1 %v1015_v6  ;;  %v1933_v4 = vld [vmem:[%s2453_s6] sm:$0xff]  }
 0x31f   : > { %1019 = vadd.xlane.f32.xlu0 %v1018_v8 }
 0x325   : > { %v1951_v9 = vpop.eup %1950 }
 0x326   : > { %v1029_v10 = vmul.f32 %v1951_v9, %v2337_v31 }
 0x328   : > { %v1037_v11 = vpack.c.bf16 %v1029_v10, %v1029_v10 }
 0x32a   : > { %1819 = vmatmul.mubr.msk.bf16.vlgmr.msra.gmra.mxu0 %vm948_vm4, %v1037_v11 }
 0x32b   : > { %1829 = vmatpush3.bf16.msra.mxu0 %v1148_v12  ;;  %1830 = vmatprep.mubr.msk.bf16.mxu0 %vm2066_vm0, %v2065_v0 }
 0x32c   : > { %1382 = vrot.lane.b32.xlu1 %v2294_v38, %s2074_s25  ;;  %1840 = vmatprep.subr.bf16.mxu0 %v2065_v0 }
 0x335   : > { %1334 = vrot.lane.b32.xlu0 %v2286_v35, %s2074_s25 }
 0x367   : > { %v1002_v13 = vpop.xlane.xlu0 %1001 }
 0x368   : > { %1952 = vrcp.f32 %v1002_v13 }
 0x36b   : > { %v1005_v14 = vpop.xlane.xlu1 %1004 }
 0x36c   : > { %1954 = vrcp.f32 %v1005_v14 }
 0x36f   : > { %v1008_v15 = vpop.xlane.xlu0 %1007  ;;  %v1287_v28 = vpop.permute.xlu1 %1286 }
 0x370   : > { %1956 = vrcp.f32 %v1008_v15  ;;  %v1292_v31 = vsel %vm1050_vm3, %v1287_v28, 0 }
 0x373   : > { %v1239_v21 = vpop.permute.xlu0 %1238 }
 0x374   : > { %v1244_v23 = vsel %vm1050_vm3, %v1239_v21, 0 }
 0x375   : > { %v1953_v16 = vpop.eup %1952 }
 0x376   : > { %v1030_v17 = vmul.f32 %v1953_v16, %v2341_v42 }
 0x378   : > { %v1038_v18 = vpack.c.bf16 %v1030_v17, %v1030_v17 }
 0x379   : > { %v1955_v19 = vpop.eup %1954 }
 0x37a   : > { %1825 = vmatmul.mubr.msk.bf16.vlgmr.msra.gmra.mxu1 %vm948_vm4, %v1038_v18  ;;  %v1031_v38 = vmul.f32 %v1955_v19, %v2345_v45 }
 0x37b   : > { %1835 = vmatpush3.bf16.msra.mxu1 %v1196_v20  ;;  %1836 = vmatprep.mubr.msk.bf16.mxu1 %vm2066_vm0, %v2065_v0 }
 0x37c   : > { %v1039_v35 = vpack.c.bf16 %v1031_v38, %v1031_v38  ;;  %1846 = vmatprep.subr.bf16.mxu1 %v2065_v0 }
 0x37d   : > { %v1957_v22 = vpop.eup %1956 }
 0x37e   : > { %1831 = vmatmul.mubr.msk.bf16.vlgmr.msra.gmra.mxu0 %vm948_vm4, %v1039_v35  ;;  %v1032_v25 = vmul.f32 %v1957_v22, %v2349_v48 }
 0x37f   : > { %1841 = vmatpush3.bf16.msra.mxu0 %v1244_v23  ;;  %1842 = vmatprep.mubr.msk.bf16.mxu0 %vm2066_vm0, %v2065_v0 }
 0x380   : > { %v1040_v30 = vpack.c.bf16 %v1032_v25, %v1032_v25  ;;  %1852 = vmatprep.subr.bf16.mxu0 %v2065_v0 }
 0x382   : > { %1837 = vmatmul.mubr.msk.bf16.vlgmr.msra.gmra.mxu1 %vm948_vm4, %v1040_v30 }
 0x383   : > { %1847 = vmatpush3.bf16.msra.mxu1 %v1292_v31  ;;  %1848 = vmatprep.mubr.msk.bf16.mxu1 %vm2066_vm0, %v2065_v0 }
 0x384   : > { %1858 = vmatprep.subr.bf16.mxu1 %v2065_v0 }
 0x3a0   : > { %v1011_v33 = vpop.xlane.xlu1 %1010 }
 0x3a1   : > { %1958 = vrcp.f32 %v1011_v33 }
 0x3a4   : > { %v1014_v34 = vpop.xlane.xlu0 %1013  ;;  %v1017_v36 = vpop.xlane.xlu1 %1016 }
 0x3a5   : > { %1960 = vrcp.f32 %v1014_v34 }
 0x3a6   : > { %1962 = vrcp.f32 %v1017_v36 }
 0x3a8   : > { %v1020_v37 = vpop.xlane.xlu0 %1019  ;;  %v1383_v44 = vpop.permute.xlu1 %1382 }
 0x3a9   : > { %1964 = vrcp.f32 %v1020_v37  ;;  %v1388_v48 = vsel %vm1050_vm3, %v1383_v44, 0 }
 0x3ac   : > { %v1335_v26 = vpop.permute.xlu0 %1334 }
 0x3ad   : > { %v1340_v42 = vsel %vm1050_vm3, %v1335_v26, 0  ;;  %v1703_v26 = vld [vmem:[#allocation4] ss:$0 sm:$0xff] }
 0x3ae   : > { %v1959_v27 = vpop.eup %1958 }
 0x3af   : > { %v1033_v39 = vmul.f32 %v1959_v27, %v2361_v32 }
 0x3b1   : > { %v1041_v40 = vpack.c.bf16 %v1033_v39, %v1033_v39 }
 0x3b2   : > { %v1961_v24 = vpop.eup %1960 }
 0x3b3   : > { %v1963_v41 = vpop.eup %1962  ;;  %1843 = vmatmul.mubr.msk.bf16.vlgmr.msra.gmra.mxu0 %vm948_vm4, %v1041_v40  ;;  %v1034_v43 = vmul.f32 %v1961_v24, %v2363_v29 }
 0x3b4   : > { %1853 = vmatpush3.bf16.msra.mxu0 %v1340_v42  ;;  %1854 = vmatprep.mubr.msk.bf16.mxu0 %vm2066_vm0, %v2065_v0  ;;  %v1035_v46 = vmul.f32 %v1963_v41, %v2367_v2 }
 0x3b5   : > { %v1042_v45 = vpack.c.bf16 %v1034_v43, %v1034_v43  ;;  %1864 = vmatprep.subr.bf16.mxu0 %v2065_v0 }
 0x3b6   : > { %v1965_v47 = vpop.eup %1964  ;;  %v1043_v49 = vpack.c.bf16 %v1035_v46, %v1035_v46 }
 0x3b7   : > { %1849 = vmatmul.mubr.msk.bf16.vlgmr.msra.gmra.mxu1 %vm948_vm4, %v1042_v45  ;;  %v1036_v50 = vmul.f32 %v1965_v47, %v2373_v7 }
 0x3b8   : > { %1859 = vmatpush3.bf16.msra.mxu1 %v1388_v48  ;;  %1860 = vmatprep.mubr.msk.bf16.mxu1 %vm2066_vm0, %v2065_v0 }
 0x3b9   : > { %v1044_v51 = vpack.c.bf16 %v1036_v50, %v1036_v50 }
 0x3bb   : > { %1855 = vmatmul.mubr.msk.bf16.vlgmr.msra.gmra.mxu0 %vm948_vm4, %v1043_v49 }
 0x3bc   : > { %1868 = vmatprep.mubr.msk.bf16.mxu0 %vm2066_vm0, %v2065_v0  ;;  %1865 = vmatpush3.bf16.msra.mxu0 %v1932_v3 }
 0x3bd   : > { %1866 = vmatprep.subr.bf16.mxu0 %v2065_v0 }
 0x3bf   : > { %1861 = vmatmul.mubr.msk.bf16.vlgmr.msra.gmra.mxu1 %vm948_vm4, %v1044_v51 }
 0x3c0   : > { %1867 = vmatpush3.bf16.msra.mxu0 %v1933_v4 }
 0x3ea   : > { %v1088_v52 = vpop.f32.mrf.mxu0 }
 0x3ec   : > { %v1820_v53 = vpop.f32.mrf.mxu0 }
 0x3ee   : > { %v1091_v54 = vpop.f32.mrf.mxu0 }
 0x3f0   : > { %v1821_v55 = vpop.f32.mrf.mxu0 }
 0x43a   : > { %v1136_v56 = vpop.f32.mrf.mxu1 }
 0x43b   : > { %1431 = vrot.lane.b32.xlu0 %v1136_v56, %s2075_s26  ;;  %v1708_v56 = vld [vmem:[#allocation6] ss:$0 sm:$0xff] }
 0x43c   : > { %v1826_v57 = vpop.f32.mrf.mxu1 }
 0x43e   : > { %v1139_v58 = vpop.f32.mrf.mxu1  ;;  %v1184_v59 = vpop.f32.mrf.mxu0 }
 0x43f   : > { %1435 = vrot.lane.b32.xlu1 %v1184_v59, %s2076_s27 }
 0x440   : > { %v1827_v60 = vpop.f32.mrf.mxu1  ;;  %v1832_v61 = vpop.f32.mrf.mxu0 }
 0x442   : > { %v1187_v62 = vpop.f32.mrf.mxu0  ;;  %v1232_v32 = vpop.f32.mrf.mxu1 }
 0x443   : > { %1439 = vrot.lane.b32.xlu0 %v1232_v32, %s2077_s28 }
 0x444   : > { %v1833_v63 = vpop.f32.mrf.mxu0  ;;  %v1838_v29 = vpop.f32.mrf.mxu1 }
 0x446   : > { %v1235_v1 = vpop.f32.mrf.mxu1 }
 0x448   : > { %v1839_v2 = vpop.f32.mrf.mxu1 }
 0x473   : > { %v1280_v6 = vpop.f32.mrf.mxu0 }
 0x474   : > { %1443 = vrot.lane.b32.xlu1 %v1280_v6, %s2078_s16 }
 0x475   : > { %v1844_v7 = vpop.f32.mrf.mxu0 }
 0x477   : > { %v1283_v8 = vpop.f32.mrf.mxu0  ;;  %v1328_v9 = vpop.f32.mrf.mxu1 }
 0x478   : > { %1447 = vrot.lane.b32.xlu0 %v1328_v9, %s2079_s17 }
 0x479   : > { %v1845_v10 = vpop.f32.mrf.mxu0  ;;  %v1850_v11 = vpop.f32.mrf.mxu1 }
 0x47b   : > { %v1331_v12 = vpop.f32.mrf.mxu1  ;;  %v1376_v13 = vpop.f32.mrf.mxu0 }
 0x47c   : > { %1451 = vrot.lane.b32.xlu1 %v1376_v13, %s2080_s18 }
 0x47d   : > { %v1851_v0 = vpop.f32.mrf.mxu1  ;;  %v1856_v14 = vpop.f32.mrf.mxu0 }
 0x47f   : > { %v1379_v15 = vpop.f32.mrf.mxu0  ;;  %v1424_v16 = vpop.f32.mrf.mxu1 }
 0x480   : > { %1455 = vrot.lane.b32.xlu0 %v1424_v16, %s2081_s19 }
 0x481   : > { %v1857_v17 = vpop.f32.mrf.mxu0  ;;  %v1862_v18 = vpop.f32.mrf.mxu1 }
 0x483   : > { %v1427_v19 = vpop.f32.mrf.mxu1 }
 0x485   : > { %v1863_v20 = vpop.f32.mrf.mxu1 }
 0x4ad   : > { %v1432_v38 = vpop.permute.xlu0 %1431 }
 0x4ae   : > { %v1458_v23 = vsel %vm579_vm2, %v1088_v52, %v1432_v38 }
 0x4b1   : > { %v1436_v21 = vpop.permute.xlu1 %1435 }
 0x4b2   : > { %v1459_v25 = vsel %vm948_vm4, %v1458_v23, %v1436_v21 }
 0x4b5   : > { %v1440_v35 = vpop.permute.xlu0 %1439 }
 0x4b6   : > { %v1461_v30 = vsel %vm1460_vm5, %v1459_v25, %v1440_v35 }
 0x4e6   : > { %v1444_v22 = vpop.permute.xlu1 %1443 }
 0x4e7   : > { %v1463_v33 = vsel %vm1462_vm6, %v1461_v30, %v1444_v22 }
 0x4ea   : > { %v1448_v28 = vpop.permute.xlu0 %1447 }
 0x4eb   : > { %v1465_v34 = vsel %vm1464_vm7, %v1463_v33, %v1448_v28 }
 0x4ee   : > { %v1452_v31 = vpop.permute.xlu1 %1451 }
 0x4ef   : > { %v1467_v36 = vsel %vm1466_vm8, %v1465_v34, %v1452_v31 }
 0x4f2   : > { %v1456_v37 = vpop.permute.xlu0 %1455 }
 0x4f3   : > { %v1469_v27 = vsel %vm1468_vm9, %v1467_v36, %v1456_v37 }
 0x4f4   : > { %v1470_v39 = vpack.c.bf16 %v1469_v27, %v1469_v27 }
 0x4f6   : > { %1869 = vmatmul.mubr.msk.bf16.vlgmr.msra.gmra.mxu0 %vm437_vm1, %v1470_v39 }
 0x5b6   : > { %v1531_v40 = vpop.f32.mrf.mxu0 }
 0x5b7   : > { %v1532_v24 = vadd.f32 %v1703_v26, %v1531_v40 }
 0x5b8   : > { %v1870_v41 = vpop.f32.mrf.mxu0 }
 0x5b9   : > { %v1537_v42 = vadd.f32 %v1532_v24, %v2235_v5  ;;  %v1707_v5 = vld [vmem:[%s2455_s8] ss:$0 sm:$0xff] }
 0x5ba   : > { %v1534_v43 = vpop.f32.mrf.mxu0 }
 0x5bb   : > { %v1538_v44 = vsel %vm437_vm1, %v1537_v42, 0.0 }
 0x5bc   : > { %1539 = vadd.xlane.f32.xlu1 %v1538_v44  ;;  %v1871_v45 = vpop.f32.mrf.mxu0 }
 0x645   : > { %v1540_v46 = vpop.xlane.xlu1 %1539 }
 0x646   : > { %v1542_v47 = vmul.f32 0.03125, %v1540_v46 }
 0x648   : > { %v1543_v48 = vsub.f32 %v1537_v42, %v1542_v47 }
 0x64a   : > { %v1544_v49 = vmul.f32 %v1543_v48, %v1543_v48 }
 0x64c   : > { %v1545_v50 = vsel %vm437_vm1, %v1544_v49, 0.0 }
 0x64d   : > { %1546 = vadd.xlane.f32.xlu0 %v1545_v50 }
 0x6d6   : > { %v1547_v51 = vpop.xlane.xlu0 %1546 }
 0x6d7   : > { %v1548_v52 = vmul.f32 0.03125, %v1547_v51 }
 0x6d9   : > { %v1549_v53 = vadd.f32 1e-05, %v1548_v52 }
 0x6db   : > { %1966 = vrsqrt.f32 %v1549_v53 }
 0x6e8   : > { %v1967_v54 = vpop.eup %1966 }
 0x6e9   : > { %v1551_v55 = vmul.f32 %v1967_v54, %v1543_v48 }
 0x6eb   : > { %v1559_v57 = vmul.f32 %v1707_v5, %v1551_v55 }
 0x6ed   : > { %v1567_v58 = vadd.f32 %v1708_v56, %v1559_v57 }
 0x6ef   : > { %1568 = vst.msk [vmem:[%s409_s24] sm:$0xff] %vm437_vm1, %v1567_v58 }
 0x6f0 PF: > { %s22_s13 = sadd.s32 1, %s2060_s13  }
 0x6f1   : > { %p19_p3 = scmp.ge.s32.totalorder %s22_s13, 4  }
 0x6f3   :  { %21 = sbr.rel (!%p19_p3) target bundleno = 2 (0x2), region = 106 }
 0x6f8   :  { %1588 = vsyncpa [#allocation3], 1 }
 0x6f9   :  { %1590 = vsyncpa [#allocation3 + $0x1], 1 }
 0x6fa   :  { %1591 = vsyncpa [#allocation5], 1 }

</bundles_post_ra>
